<compile_context>
chip_gen: v5e
topology: v5e:2x2
jax: 0.10.0
libtpu: 0.0.40
codegen_flags: <defaults>
</compile_context>

<pallas_src>
import functools

import jax
import jax.numpy as jnp
from jax.experimental import pallas as pl
from jax.experimental.pallas import tpu as pltpu


_INV_255 = 1.0 / 255.0

# Tile sizes (all multiples of 128 so full blocks store lane-dense / unmasked).
_PACKED_TILE = 16384   # pixels per block, packed-int32 fast path (lane-dense)
_GENERAL_TILE = 2048   # pixels per block, generic (1, tile, C) path (lane-padded VMEM)
_FLAT_TILE = 32768     # elements per block, swap_axis=False scale-copy path


# ----------------------------------------------------------------------------
# Helpers
# ----------------------------------------------------------------------------
def _pick_tile(extent, target):
    """Full extent if it fits (always legal), otherwise a fixed 128-multiple tile."""
    if extent <= target:
        return extent
    return target  # target is a multiple of 128; cdiv grid masks the tail block


@functools.lru_cache(maxsize=1)
def _u8x4_byte_shifts():
    """Per-channel bit shifts after bitcasting 4 x uint8 -> int32 (byte-order probe)."""
    probe = int(jax.lax.bitcast_convert_type(
        jnp.arange(4, dtype=jnp.uint8).reshape(1, 4), jnp.int32)[0])
    shifts = []
    for ch in range(4):
        shifts.append(next(s for s in (0, 8, 16, 24) if ((probe >> s) & 0xFF) == ch))
    return tuple(shifts)


def _to_f32(x):
    # Go through int32 for integer inputs (robust unpack path), then to f32.
    if jnp.issubdtype(x.dtype, jnp.integer):
        x = x.astype(jnp.int32)
    return x.astype(jnp.float32)


# ----------------------------------------------------------------------------
# Kernels
# ----------------------------------------------------------------------------
def _packed_c4_kernel(x_ref, o_ref, *, scale, shifts):
    """uint8 / C==4 fast path.

    x_ref: (1, 1, tile) int32, each element packs the 4 channel bytes of one pixel.
    o_ref: (1, 4, tile) float — channel-major, lane-dense stores.
    """
    u = x_ref[0]                                   # (1, tile) int32
    chans = []
    for sh in shifts:
        v = (u >> sh) if sh else u                 # arithmetic shift ok: masked next
        ch = (v & 0xFF).astype(jnp.float32)        # VPU convert
        if scale != 1.0:
            ch = ch * jnp.float32(scale)
        chans.append(ch.astype(o_ref.dtype))
    o_ref[0] = jnp.concatenate(chans, axis=0)      # (4, tile)


def _nhwc_to_nchw_kernel(x_ref, o_ref, *, scale):
    """Generic path (any dtype / channel count).

    x_ref: (1, tile, C) native dtype -> o_ref: (1, C, tile) float.
    """
    x = _to_f32(x_ref[0])                          # (tile, C), cast in-kernel (VPU)
    y = x.T                                        # (C, tile): XLU transpose, lane-dense result
    if scale != 1.0:
        y = y * jnp.float32(scale)
    o_ref[0] = y.astype(o_ref.dtype)


def _scale_copy_kernel(x_ref, o_ref, *, scale):
    """swap_axis=False path: lane-dense elementwise scale-copy."""
    x = _to_f32(x_ref[...])
    if scale != 1.0:
        x = x * jnp.float32(scale)
    o_ref[...] = x.astype(o_ref.dtype)


# ----------------------------------------------------------------------------
# Wrapper
# ----------------------------------------------------------------------------
def image_preprocess(x_nhwc, *, normalize=True, swap_axis=True, out_dtype=None):
    """Pallas port of ImagePreprocess: optional /255 and NHWC -> NCHW permute."""
    if x_nhwc.ndim != 4:
        raise ValueError(f"expected NHWC input, got shape {x_nhwc.shape}")
    n, h, w, c = x_nhwc.shape

    if not normalize and not swap_axis:
        return x_nhwc  # identity; dtype preserved, .contiguous() is a no-op in JAX

    scale = _INV_255 if normalize else 1.0
    if out_dtype is None:
        if normalize:
            out_dtype = jnp.float32
        elif jnp.issubdtype(x_nhwc.dtype, jnp.floating):
            out_dtype = x_nhwc.dtype
        else:
            # TODO(synk): torch's permute-only path preserves integer dtypes; integer
            # NCHW output is not implemented here, so we promote to float32.
            out_dtype = jnp.float32

    hw = h * w
    cparams = pltpu.CompilerParams(dimension_semantics=("parallel", "parallel"))

    if swap_axis:
        if x_nhwc.dtype == jnp.uint8 and c == 4:
            # ---- Fast path: lane-dense packed-int32 DMA, deinterleave on the VPU.
            packed = jax.lax.bitcast_convert_type(
                x_nhwc.reshape(n, hw, 4), jnp.int32)       # byte-preserving, no amplification
            packed = packed.reshape(n, 1, hw)               # free reshape
            tile = _pick_tile(hw, _PACKED_TILE)
            grid = (n, pl.cdiv(hw, tile))
            kernel = functools.partial(
                _packed_c4_kernel, scale=scale, shifts=_u8x4_byte_shifts())
            out = pl.pallas_call(
                kernel,
                out_shape=jax.ShapeDtypeStruct((n, 4, hw), out_dtype),
                grid=grid,
                in_specs=[pl.BlockSpec((1, 1, tile), lambda i, j: (i, 0, j))],
                out_specs=pl.BlockSpec((1, 4, tile), lambda i, j: (i, 0, j)),
                compiler_params=cparams,
            )(packed)
        else:
            # ---- Generic path: native dtype through the DMA, cast + transpose in-kernel.
            x_flat = x_nhwc.reshape(n, hw, c)               # free reshape, no upcast
            tile = _pick_tile(hw, _GENERAL_TILE)
            grid = (n, pl.cdiv(hw, tile))
            kernel = functools.partial(_nhwc_to_nchw_kernel, scale=scale)
            out = pl.pallas_call(
                kernel,
                out_shape=jax.ShapeDtypeStruct((n, c, hw), out_dtype),
                grid=grid,
                in_specs=[pl.BlockSpec((1, tile, c), lambda i, j: (i, j, 0))],
                out_specs=pl.BlockSpec((1, c, tile), lambda i, j: (i, 0, j)),
                compiler_params=cparams,
            )(x_flat)
        return out.reshape(n, c, h, w)                      # free reshape

    # ---- swap_axis=False: flat lane-dense scale-copy.
    hwc = hw * c
    x_flat = x_nhwc.reshape(n, 1, hwc)                      # free reshape, native dtype
    tile = _pick_tile(hwc, _FLAT_TILE)
    grid = (n, pl.cdiv(hwc, tile))
    kernel = functools.partial(_scale_copy_kernel, scale=scale)
    out = pl.pallas_call(
        kernel,
        out_shape=jax.ShapeDtypeStruct((n, 1, hwc), out_dtype),
        grid=grid,
        in_specs=[pl.BlockSpec((1, 1, tile), lambda i, j: (i, 0, j))],
        out_specs=pl.BlockSpec((1, 1, tile), lambda i, j: (i, 0, j)),
        compiler_params=cparams,
    )(x_flat)
    return out.reshape(n, h, w, c)


# ----------------------------------------------------------------------------
# Demo / correctness check
# ----------------------------------------------------------------------------
if __name__ == "__main__":
    key = jax.random.PRNGKey(0)
    n, h, w, c = 2, 16, 16, 4
    k1, k2 = jax.random.split(key)

    # 1) Typical image input: uint8 NHWC (fast packed lane-dense path).
    x_u8 = jax.random.randint(k1, (n, h, w, c), 0, 256, dtype=jnp.int32).astype(jnp.uint8)
    out = jax.block_until_ready(image_preprocess(x_u8))          # normalize + swap
    assert out.shape == (n, c, h, w), out.shape
    ref = jnp.transpose(x_u8.astype(jnp.float32), (0, 3, 1, 2)) / 255.0
    assert jnp.allclose(out, ref, rtol=1e-6, atol=1e-6), "fast path mismatch"

    # 2) float32 input, 3 channels (generic transpose path, no wrapper upcast).
    x_f32 = jax.random.uniform(k2, (n, h, w, 3), jnp.float32, 0.0, 255.0)
    out2 = jax.block_until_ready(image_preprocess(x_f32))
    assert out2.shape == (n, 3, h, w), out2.shape
    ref2 = jnp.transpose(x_f32, (0, 3, 1, 2)) / 255.0
    assert jnp.allclose(out2, ref2, rtol=1e-6, atol=1e-6), "general path mismatch"

    # 3) normalize only (lane-dense flat scale-copy path).
    out3 = jax.block_until_ready(image_preprocess(x_u8, swap_axis=False))
    assert out3.shape == (n, h, w, c), out3.shape
    ref3 = x_u8.astype(jnp.float32) / 255.0
    assert jnp.allclose(out3, ref3, rtol=1e-6, atol=1e-6), "scale-only path mismatch"

    print("KERNEL_OK")
</pallas_src>

<mosaic_0001>
module attributes {stable_mosaic.version = 11 : i64} {
  func.func @_packed_c4_kernel(%arg0: i32, %arg1: i32, %arg2: memref<1x1x256xi32, #tpu.memory_space<vmem>>, %arg3: memref<1x4x256xf32, #tpu.memory_space<vmem>>) attributes {dimension_semantics = [#tpu.dimension_semantics<parallel>, #tpu.dimension_semantics<parallel>], iteration_bounds = array<i64: 2, 1>, scalar_prefetch = 0 : i64, scratch_operands = 0 : i64, tpu.core_type = #tpu.core_type<tc>, window_params = [{transform_indices = @transform_0, window_bounds = array<i64: 1, 1, 256>}, {transform_indices = @transform_1, window_bounds = array<i64: 1, 4, 256>}]} {
    %c0 = arith.constant 0 : index
    %c0_0 = arith.constant 0 : index
    %c0_1 = arith.constant 0 : index
    %0 = vector.load %arg2[%c0, %c0_0, %c0_1] : memref<1x1x256xi32, #tpu.memory_space<vmem>>, vector<1x1x256xi32>
    %1 = vector.shape_cast %0 : vector<1x1x256xi32> to vector<1x256xi32>
    %c255_i32 = arith.constant 255 : i32
    %2 = vector.broadcast %c255_i32 : i32 to vector<1x256xi32>
    %3 = arith.andi %1, %2 : vector<1x256xi32>
    %4 = arith.sitofp %3 : vector<1x256xi32> to vector<1x256xf32>
    %cst = arith.constant 0.00392156886 : f32
    %5 = vector.broadcast %cst : f32 to vector<1x256xf32>
    %6 = arith.mulf %4, %5 : vector<1x256xf32>
    %c8_i32 = arith.constant 8 : i32
    %7 = vector.broadcast %c8_i32 : i32 to vector<1x256xi32>
    %8 = arith.shrsi %1, %7 : vector<1x256xi32>
    %c255_i32_2 = arith.constant 255 : i32
    %9 = vector.broadcast %c255_i32_2 : i32 to vector<1x256xi32>
    %10 = arith.andi %8, %9 : vector<1x256xi32>
    %11 = arith.sitofp %10 : vector<1x256xi32> to vector<1x256xf32>
    %cst_3 = arith.constant 0.00392156886 : f32
    %12 = vector.broadcast %cst_3 : f32 to vector<1x256xf32>
    %13 = arith.mulf %11, %12 : vector<1x256xf32>
    %c16_i32 = arith.constant 16 : i32
    %14 = vector.broadcast %c16_i32 : i32 to vector<1x256xi32>
    %15 = arith.shrsi %1, %14 : vector<1x256xi32>
    %c255_i32_4 = arith.constant 255 : i32
    %16 = vector.broadcast %c255_i32_4 : i32 to vector<1x256xi32>
    %17 = arith.andi %15, %16 : vector<1x256xi32>
    %18 = arith.sitofp %17 : vector<1x256xi32> to vector<1x256xf32>
    %cst_5 = arith.constant 0.00392156886 : f32
    %19 = vector.broadcast %cst_5 : f32 to vector<1x256xf32>
    %20 = arith.mulf %18, %19 : vector<1x256xf32>
    %c24_i32 = arith.constant 24 : i32
    %21 = vector.broadcast %c24_i32 : i32 to vector<1x256xi32>
    %22 = arith.shrsi %1, %21 : vector<1x256xi32>
    %c255_i32_6 = arith.constant 255 : i32
    %23 = vector.broadcast %c255_i32_6 : i32 to vector<1x256xi32>
    %24 = arith.andi %22, %23 : vector<1x256xi32>
    %25 = arith.sitofp %24 : vector<1x256xi32> to vector<1x256xf32>
    %cst_7 = arith.constant 0.00392156886 : f32
    %26 = vector.broadcast %cst_7 : f32 to vector<1x256xf32>
    %27 = arith.mulf %25, %26 : vector<1x256xf32>
    %28 = tpu.concatenate %6, %13, %20, %27 in 0 : vector<1x256xf32>, vector<1x256xf32>, vector<1x256xf32>, vector<1x256xf32> -> vector<4x256xf32>
    %c0_8 = arith.constant 0 : index
    %c0_9 = arith.constant 0 : index
    %c0_10 = arith.constant 0 : index
    %29 = vector.load %arg3[%c0_8, %c0_9, %c0_10] : memref<1x4x256xf32, #tpu.memory_space<vmem>>, vector<1x4x256xf32>
    %30 = vector.shape_cast %29 : vector<1x4x256xf32> to vector<4x256xf32>
    %31 = vector.shape_cast %28 : vector<4x256xf32> to vector<1x4x256xf32>
    tpu.vector_store %arg3[%c0_8, %c0_9, %c0_10], %31 {strides = array<i32>} : memref<1x4x256xf32, #tpu.memory_space<vmem>>, vector<1x4x256xf32>,
    return
  }
  func.func @transform_0(%arg0: i32, %arg1: i32) -> (i32, i32, i32) {
    %c0_i32 = arith.constant 0 : i32
    %c0_i32_0 = arith.constant 0 : i32
    return %arg0, %c0_i32, %arg1 : i32, i32, i32
  }
  func.func @transform_1(%arg0: i32, %arg1: i32) -> (i32, i32, i32) {
    %c0_i32 = arith.constant 0 : i32
    %c0_i32_0 = arith.constant 0 : i32
    return %arg0, %c0_i32, %arg1 : i32, i32, i32
  }
}

</mosaic_0001>

<bundles_post_ra>
// kernel: tpu_custom_call.1
= control target key start
LH: loop header
LB: loop body
LE: loop exit
PB: predicated region body
PF: predicated region fallthrough
CT: control target
= control target key end

     0   :  { %6 = vsyncpa [#allocation3], 0  ;;  %s631_s0 = inlined_call_operand.hbm [shape: s32[2,1,256], index: 0, kind: input, shape index: {}]   ;;  %s632_s1 = inlined_call_operand.hbm [shape: f32[2,4,256], index: 1, kind: output, shape index: {}]  }
   0x1   :  { %8 = vsyncpa [#allocation3 + $0x1], 0 }
   0x2   :  { %9 = vsyncpa [#allocation4], 0 }
   0x3   :  { %11 = vsyncpa [#allocation4 + $0x1], 0  ;;  %s510_s6 = smov 0   ;;  %s512_s7 = smov 0  }
   0x4   :  { %s514_s8 = smov 0   ;;  %s516_s9 = smov 0  }
   0x5   :  { %s518_s10 = smov 0   ;;  %s520_s11 = smov 0  }
   0x6 LB: > { %s308_s12 = sadd.s32 4294967295, %s498_s11   ;;  %s309_s13 = sadd.s32 4294967294, %s498_s11   ;;  %s498_s11 = sphi %s520_s11, %s17_s11   ;;  %s494_s10 = sphi %s518_s10, %s641_s10   ;;  %s490_s9 = sphi %s516_s9, %s640_s9   ;;  %s486_s8 = sphi %s514_s8, %s639_s8   ;;  %s482_s7 = sphi %s512_s7, %s638_s7   ;;  %s478_s6 = sphi %s510_s6, %s637_s6  }
   0x7   : > { %s29_s14 = sadd.s32 1, %s494_s10  ;;  %s38_s15 = sadd.s32 1, %s486_s8 }
   0x8   : > { %p31_p0 = scmp.ge.s32.totalorder %s29_s14, 2  ;;  %p45_p1 = scmp.ne.s32.totalorder %s486_s8, %s482_s7 }
   0x9   : > { %p46_p2 = scmp.eq.s32.totalorder %s498_s11, 0  ;;  %p51_p3 = scmp.ne.s32.totalorder %s482_s7, %s478_s6 }
   0xa   : > { %s643_s14 = smov (%p31_p0, %s29_s14), 0  ;;  %p52_p5 = scmp.eq.s32.totalorder %s308_s12, 0 }
   0xb   : > { %p551_p4 = por %p46_p2, %p45_p1  ;;  %s33_s17 = ssub.s32 %s494_s10, %s643_s14 }
   0xc   : > { %p77_p6 = scmp.eq.s32.totalorder %s308_s12, 1  ;;  %p36_p7 = scmp.eq.s32.totalorder %s33_s17, 0 }
   0xd   : > { %p557_p8 = por %p52_p5, %p51_p3  ;;  %p83_p10 = scmp.eq.s32.totalorder %s309_s13, 1 }
   0xe   : > { %p561_p9 = por %p77_p6, %p45_p1  ;;  %p311_p12 = scmp.ge.s32.totalorder %s498_s11, 2 }
   0xf   : > { %s566_s20 = scalar_select %p36_p7, %s486_s8, %s38_s15  }
  0x10   : > { %p568_p11 = por %p83_p10, %p51_p3  ;;  %p336_p13 = scmp.lt.s32.totalorder %s498_s11, 2 }
  0x11   : > { %s103_s22 = sand.u32 1, %s486_s8   ;;  %s313_s24 = sshll.u32 %s494_s10, 1 }
  0x12   : > { %s312_s23 = sshll.u32 %s103_s22, 1  ;;  %s113_s27 = scalar_lea.hbm %s631_s0, %s313_s24 }
  0x13   : > { %s107_s28 = scalar_lea.vmem [#allocation2], %s312_s23  ;;  %s115_s30 = sshll.u32 %s113_s27, 4  ;;  %s116_s30 = int_to_ptr.hbm [resolvable:$true] %s115_s30 }
  0x14   : > { %s117_s29 = sshll.u32 %s107_s28, 4  ;;  %p329_p0 = pnand %p336_p13, %p551_p4  ;;  %s118_s29 = int_to_ptr.vmem [resolvable:$true] %s117_s29 }
  0x15   : > { %p314_p1 = scmp.ge.s32.totalorder %s498_s11, 1  ;;  %p122_p2 = scmp.lt.s32.totalorder %s498_s11, 3 }
  0x16   : > { %s104_s2 = scalar_lea.sflag [#allocation3], %s103_s22 }
  0x17   : > { %331 = dma.hbm_to_vmem [thread:$0]  (!%p329_p0), %s116_s30, 32, %s118_s29, %s104_s2  }
  0x18   : > { %p123_p3 = pnand %p314_p1, %p122_p2 }
  0x19   : > { %s584_s3 = sand.u32 (!%p123_p3), 1, %s482_s7  }
  0x1a   : > { %126 = sbr.rel (%p123_p3) target bundleno = 52 (0x34), region = 24  ;;  %s315_s4 = sshll.u32 (!%p123_p3), %s584_s3, 1 }
  0x1b   : > { %s129_s5 = scalar_lea.sflag (!%p123_p3), [#allocation3], %s584_s3  ;;  %s132_s12 = scalar_lea.vmem (!%p123_p3), [#allocation2], %s315_s4 }
  0x1f   : > { %469 = dma.done.wait (%p557_p8), %s129_s5, 32  }
  0x20   : > { %471 = vsyncadd (%p557_p8), %s129_s5, 4294967264  ;;  %v154_v0 = vld [vmem:[%s132_s12] sm:$0x3]  ;;  %s316_s13 = sshll.u32 %s584_s3, 3  ;;  %s323_s15 = sshll.u32 %s490_s9, 3  ;;  %vm190_vm0 = vcmask 1040384  }
  0x21   : > { %v155_v1 = vand.u32 255, %v154_v0  ;;  %v158_v2 = vshra.s32 %v154_v0, 8  ;;  %v162_v3 = vshra.s32 %v154_v0, 16  ;;  %v317_v4 = vshrl.u32 %v154_v0, 24  ;;  %s220_s18 = scalar_lea.hbm %s632_s1, %s323_s15  ;;  %s151_s9 = scalar_lea.vmem [#allocation5], %s316_s13 }
  0x22   : > { %vm193_vm1 = vcmask 1041408   ;;  %vm196_vm2 = vcmask 1042432   ;;  %s222_s22 = sshll.u32 %s151_s9, 4  ;;  %s224_s23 = sshll.u32 %s220_s18, 4  ;;  %vm202_vm3 = vcmask 1043456   ;;  %s223_s22 = int_to_ptr.vmem [resolvable:$true] %s222_s22  ;;  %s225_s23 = int_to_ptr.hbm [resolvable:$true] %s224_s23 }
  0x23   : > { %v156_v5 = vcvt.s32.f32 %v155_v1  ;;  %v159_v6 = vand.u32 255, %v158_v2  ;;  %v163_v7 = vand.u32 255, %v162_v3  ;;  %v168_v8 = vcvt.s32.f32 %v317_v4  ;;  %s207_s24 = scalar_lea.sflag [#allocation4], %s584_s3  ;;  %s430_s25 = sshra.s32 %s225_s23, 4  ;;  %s431_s25 = int_to_ptr.hbm [resolvable:$true] %s430_s25 }
  0x24   : > { %s432_s26 = scalar_lea.hbm %s431_s25, 8  ;;  %s436_s29 = scalar_lea.hbm %s632_s1, 16 }
  0x25   : > { %v157_v9 = vmul.f32 0.003921569, %v156_v5  ;;  %v160_v10 = vcvt.s32.f32 %v159_v6  ;;  %v164_v11 = vcvt.s32.f32 %v163_v7  ;;  %v169_v12 = vmul.f32 0.003921569, %v168_v8  ;;  %p433_p4 = scmp.ne.s32.totalorder %s431_s25, %s432_s26  ;;  %p437_p7 = scmp.lt.s32.totalorder %s431_s25, %s632_s1 }
  0x26   : > { %p438_p8 = scmp.lt.s32.totalorder %s436_s29, %s432_s26 }
  0x27   : > { %v161_v13 = vmul.f32 0.003921569, %v160_v10  ;;  %v165_v14 = vmul.f32 0.003921569, %v164_v11  ;;  %v171_v15 = vperm.slane %v157_v9, 0  ;;  %v172_v16 = vperm.slane %v157_v9, 1  ;;  %p434_p5 = pnand %p433_p4, %p561_p9 }
  0x28   : > { %v186_v17 = vperm.slane %v169_v12, 0  ;;  %v187_v18 = vperm.slane %v169_v12, 1  ;;  %p439_p10 = por %p438_p8, %p437_p7 }
  0x29   : > { %v176_v19 = vperm.slane %v161_v13, 0  ;;  %v177_v20 = vperm.slane %v161_v13, 1  ;;  %v181_v21 = vperm.slane %v165_v14, 0  ;;  %v182_v22 = vperm.slane %v165_v14, 1  ;;  %p435_p6 = pneg %p434_p5 }
  0x2b   : > { %v191_v23 = vsel %vm190_vm0, %v171_v15, %v176_v19  ;;  %v192_v24 = vsel %vm190_vm0, %v172_v16, %v177_v20  ;;  %p440_p13 = pnand %p439_p10, %p435_p6 }
  0x2c   : > { %v194_v25 = vsel %vm193_vm1, %v191_v23, %v181_v21  ;;  %v195_v26 = vsel %vm193_vm1, %v192_v24, %v182_v22 }
  0x2d   : > { %v197_v27 = vsel %vm196_vm2, %v194_v25, %v186_v17  ;;  %v198_v28 = vsel %vm196_vm2, %v195_v26, %v187_v18 }
  0x2e   : > { %v201_v29 = vrot.slane %v198_v28, 4 }
  0x30   : > { %v203_v30 = vsel %vm202_vm3, %v197_v27, %v201_v29 }
  0x31   : > { %205 = vst [vmem:[%s151_s9] sm:$0xff] %v203_v30 }
  0x32   : > { %443 = shalt.err (!%p440_p13)
}
  0x33   : > { %326 = dma.vmem_to_hbm [thread:$0]  (%p561_p9), %s223_s22, 128, %s225_s23, %s207_s24  }
  0x34 PF: > { %s236_s3 = sand.u32 1, %s478_s6   ;;  %p333_p0 = pnand %p311_p12, %p568_p11 }
  0x35   : > { %s237_s4 = scalar_lea.sflag [#allocation4], %s236_s3 }
  0x36   : > { %p334_p1 = pneg %p333_p0 }
  0x38   : > { %473 = dma.done.wait (%p334_p1), %s237_s4, 128  }
  0x39   : > { %475 = vsyncadd (%p334_p1), %s237_s4, 4294967168  ;;  %s17_s11 = sadd.s32 1, %s498_s11   ;;  %s637_s6 = smov %s482_s7 }
  0x3a   : > { %p14_p2 = scmp.ge.s32.totalorder %s17_s11, 4   ;;  %s638_s7 = smov %s486_s8 }
  0x3b   : > { %s639_s8 = smov %s566_s20  ;;  %s640_s9 = smov %s494_s10 }
  0x3c   : > { %s641_s10 = smov %s643_s14  ;;  %16 = sbr.rel (!%p14_p2) target bundleno = 6 (0x6), region = 69 }
  0x41   :  { %243 = vsyncpa [#allocation3], 1 }
  0x42   :  { %245 = vsyncpa [#allocation3 + $0x1], 1 }
  0x43   :  { %246 = vsyncpa [#allocation4], 1 }
  0x44   :  { %248 = vsyncpa [#allocation4 + $0x1], 1 }

</bundles_post_ra>
